<compile_context>
chip_gen: v7x
topology: tpu7x:2x2x1
jax: 0.10.0
libtpu: 0.0.40
codegen_flags: <defaults>
</compile_context>

<pallas_src>
import functools

import jax
import jax.numpy as jnp
from jax.experimental import pallas as pl
from jax.experimental.pallas import tpu as pltpu


def _sge_kernel(w_ref, b_ref, x_ref, o_ref, *, var_denom):
    # x block: (TG, cpg, hw); weight/bias blocks: (TG, 1, 1) float32.
    x = x_ref[...].astype(jnp.float32)                        # (TG, cpg, hw)

    # AdaptiveAvgPool2d(1): mean over spatial, per channel.
    pooled = jnp.mean(x, axis=-1, keepdims=True)              # (TG, cpg, 1)

    # xn = (x * pooled) summed over channels.
    xn = jnp.sum(x * pooled, axis=1, keepdims=True)           # (TG, 1, hw)

    # Normalize over spatial positions (torch.std default: unbiased, /(N-1)).
    t = xn - jnp.mean(xn, axis=-1, keepdims=True)             # (TG, 1, hw)
    var = jnp.sum(t * t, axis=-1, keepdims=True) / var_denom  # (TG, 1, 1)
    std = jnp.sqrt(var) + 1e-5
    t = t * pl.reciprocal(std, approx=True)                   # EUP reciprocal

    # Per-(batch, group) affine, broadcast over spatial positions.
    t = t * w_ref[...] + b_ref[...]                           # (TG, 1, hw)

    # Sigmoid gate applied to the original x.
    o_ref[...] = (x * jax.nn.sigmoid(t)).astype(o_ref.dtype)


def _choose_group_block(bg, cpg, hw, itemsize, target_block_bytes):
    """Pick TG = number of (batch, group) rows per block.

    Constraints: block ~= target_block_bytes, TG divides bg (no partial
    blocks), and when possible keep >= 2 grid steps (v7x has 2 TensorCores).
    """
    per_group = cpg * hw * itemsize
    cap = max(1, target_block_bytes // per_group)
    if bg >= 2:
        cap = min(cap, bg // 2)
    cap = int(max(1, min(cap, bg)))
    best = 1
    for d in range(1, cap + 1):
        if bg % d == 0:
            best = d
    return best


def spatial_group_enhance(x, weight, bias, groups, *, target_block_bytes=4 << 20):
    """x: (b, c, h, w) float32 or bfloat16; weight/bias: (1, groups, 1, 1)."""
    b, c, h, w = x.shape
    assert c % groups == 0
    cpg = c // groups
    hw = h * w
    bg = b * groups

    x_flat = x.reshape(bg, cpg, hw)

    # Per-(batch, group) affine params, one row per grid row (tiny arrays).
    w_per = jnp.tile(weight.reshape(groups), (b,)).reshape(bg, 1, 1)
    b_per = jnp.tile(bias.reshape(groups), (b,)).reshape(bg, 1, 1)
    w_per = w_per.astype(jnp.float32)
    b_per = b_per.astype(jnp.float32)

    itemsize = jnp.dtype(x.dtype).itemsize
    tg = _choose_group_block(bg, cpg, hw, itemsize, target_block_bytes)
    grid = (bg // tg,)

    # Double-buffered input + output blocks (+ tiny param blocks + slack),
    # clamped so the scoped limit is also safe on v7x's 64 MiB physical VMEM.
    block_bytes = tg * cpg * hw * itemsize
    vmem_limit = int(min(max(4 * block_bytes + (2 << 20), 16 << 20), 48 << 20))

    # PyTorch's unbiased std divides by hw - 1; hw == 1 would be NaN in
    # PyTorch too -- guard the static denominator so we never emit a /0.
    kernel = functools.partial(_sge_kernel, var_denom=float(max(hw - 1, 1)))

    out_flat = pl.pallas_call(
        kernel,
        out_shape=jax.ShapeDtypeStruct((bg, cpg, hw), x.dtype),
        grid=grid,
        in_specs=[
            pl.BlockSpec((tg, 1, 1), lambda i: (i, 0, 0)),     # weight rows
            pl.BlockSpec((tg, 1, 1), lambda i: (i, 0, 0)),     # bias rows
            pl.BlockSpec((tg, cpg, hw), lambda i: (i, 0, 0)),  # x block
        ],
        out_specs=pl.BlockSpec((tg, cpg, hw), lambda i: (i, 0, 0)),
        compiler_params=pltpu.CompilerParams(
            dimension_semantics=("parallel",),
            vmem_limit_bytes=vmem_limit,
        ),
    )(w_per, b_per, x_flat)

    return out_flat.reshape(b, c, h, w)


def _reference(x, weight, bias, groups):
    # Pure-JAX reference mirroring the PyTorch forward, for verification.
    b, c, h, w = x.shape
    xg = x.reshape(b * groups, c // groups, h, w).astype(jnp.float32)
    pooled = jnp.mean(xg, axis=(2, 3), keepdims=True)
    xn = jnp.sum(xg * pooled, axis=1, keepdims=True)
    t = xn.reshape(b * groups, -1)
    t = t - jnp.mean(t, axis=1, keepdims=True)
    std = jnp.std(t, axis=1, keepdims=True, ddof=1) + 1e-5
    t = t / std
    t = t.reshape(b, groups, h, w)
    t = t * weight + bias
    t = t.reshape(b * groups, 1, h, w)
    out = xg * jax.nn.sigmoid(t)
    return out.reshape(b, c, h, w)


if __name__ == "__main__":
    key = jax.random.PRNGKey(0)
    k_x, k_w, k_b, k_x2 = jax.random.split(key, 4)

    # Case 1: f32, hw a multiple of 128 (lane dense), TG=2 rows per block.
    b, c, h, w = 2, 4, 16, 16
    groups = 2
    x = jax.random.normal(k_x, (b, c, h, w), dtype=jnp.float32)
    # Module __init__ zero-inits weight/bias; use small random values so the
    # compute path is actually exercised.
    weight = 0.1 * jax.random.normal(k_w, (1, groups, 1, 1), dtype=jnp.float32)
    bias = 0.1 * jax.random.normal(k_b, (1, groups, 1, 1), dtype=jnp.float32)

    out = jax.block_until_ready(spatial_group_enhance(x, weight, bias, groups))
    ref = _reference(x, weight, bias, groups)
    # approx reciprocal (EUP) bounds accuracy ~1e-4; 1e-3 still catches bugs.
    assert jnp.allclose(out, ref, atol=1e-3, rtol=1e-3), "f32 mismatch"

    # Case 2: bf16 I/O path (math stays f32 inside the kernel).
    x_bf16 = x.astype(jnp.bfloat16)
    out_bf16 = jax.block_until_ready(
        spatial_group_enhance(x_bf16, weight, bias, groups))
    assert out_bf16.dtype == jnp.bfloat16
    ref_bf16 = _reference(x_bf16.astype(jnp.float32), weight, bias, groups)
    assert jnp.allclose(out_bf16.astype(jnp.float32), ref_bf16,
                        atol=3e-2, rtol=3e-2), "bf16 mismatch"

    # Case 3: f32, many groups per block (TG=16) and hw < 128 (masked stores).
    b2, c2, h2, w2, groups2 = 4, 32, 8, 8, 8
    x2 = jax.random.normal(k_x2, (b2, c2, h2, w2), dtype=jnp.float32)
    w2p = 0.1 * jax.random.normal(k_w, (1, groups2, 1, 1), dtype=jnp.float32)
    b2p = 0.1 * jax.random.normal(k_b, (1, groups2, 1, 1), dtype=jnp.float32)
    out2 = jax.block_until_ready(spatial_group_enhance(x2, w2p, b2p, groups2))
    ref2 = _reference(x2, w2p, b2p, groups2)
    assert jnp.allclose(out2, ref2, atol=1e-3, rtol=1e-3), "case-3 mismatch"

    print("KERNEL_OK")
</pallas_src>

<mosaic_0001>
module attributes {stable_mosaic.version = 11 : i64} {
  func.func @_sge_kernel(%arg0: i32, %arg1: memref<2x1x1xf32, #tpu.memory_space<vmem>>, %arg2: memref<2x1x1xf32, #tpu.memory_space<vmem>>, %arg3: memref<2x2x256xf32, #tpu.memory_space<vmem>>, %arg4: memref<2x2x256xf32, #tpu.memory_space<vmem>>) attributes {dimension_semantics = [#tpu.dimension_semantics<parallel>], iteration_bounds = array<i64: 2>, scalar_prefetch = 0 : i64, scratch_operands = 0 : i64, tpu.core_type = #tpu.core_type<tc>, window_params = [{transform_indices = @transform_0, window_bounds = array<i64: 2, 1, 1>}, {transform_indices = @transform_1, window_bounds = array<i64: 2, 1, 1>}, {transform_indices = @transform_2, window_bounds = array<i64: 2, 2, 256>}, {transform_indices = @transform_3, window_bounds = array<i64: 2, 2, 256>}]} {
    %c0 = arith.constant 0 : index
    %c0_0 = arith.constant 0 : index
    %c0_1 = arith.constant 0 : index
    %0 = vector.load %arg3[%c0, %c0_0, %c0_1] : memref<2x2x256xf32, #tpu.memory_space<vmem>>, vector<2x2x256xf32>
    %cst = arith.constant dense<0.000000e+00> : vector<2x2xf32>
    %1 = vector.multi_reduction <add>, %0, %cst [2] : vector<2x2x256xf32> to vector<2x2xf32>
    %2 = vector.shape_cast %1 : vector<2x2xf32> to vector<2x2x1xf32>
    %cst_2 = arith.constant 2.560000e+02 : f32
    %3 = vector.broadcast %cst_2 : f32 to vector<2x2x1xf32>
    %4 = arith.divf %2, %3 : vector<2x2x1xf32>
    %5 = vector.broadcast %4 : vector<2x2x1xf32> to vector<2x2x256xf32>
    %6 = arith.mulf %0, %5 : vector<2x2x256xf32>
    %cst_3 = arith.constant dense<0.000000e+00> : vector<2x256xf32>
    %7 = vector.multi_reduction <add>, %6, %cst_3 [1] : vector<2x2x256xf32> to vector<2x256xf32>
    %8 = vector.shape_cast %7 : vector<2x256xf32> to vector<2x1x256xf32>
    %cst_4 = arith.constant dense<0.000000e+00> : vector<2x1xf32>
    %9 = vector.multi_reduction <add>, %8, %cst_4 [2] : vector<2x1x256xf32> to vector<2x1xf32>
    %10 = vector.shape_cast %9 : vector<2x1xf32> to vector<2x1x1xf32>
    %cst_5 = arith.constant 2.560000e+02 : f32
    %11 = vector.broadcast %cst_5 : f32 to vector<2x1x1xf32>
    %12 = arith.divf %10, %11 : vector<2x1x1xf32>
    %13 = vector.broadcast %12 : vector<2x1x1xf32> to vector<2x1x256xf32>
    %14 = arith.subf %8, %13 : vector<2x1x256xf32>
    %15 = arith.mulf %14, %14 : vector<2x1x256xf32>
    %cst_6 = arith.constant dense<0.000000e+00> : vector<2x1xf32>
    %16 = vector.multi_reduction <add>, %15, %cst_6 [2] : vector<2x1x256xf32> to vector<2x1xf32>
    %17 = vector.shape_cast %16 : vector<2x1xf32> to vector<2x1x1xf32>
    %cst_7 = arith.constant 2.550000e+02 : f32
    %18 = vector.broadcast %cst_7 : f32 to vector<2x1x1xf32>
    %19 = arith.divf %17, %18 : vector<2x1x1xf32>
    %20 = math.sqrt %19 : vector<2x1x1xf32>
    %cst_8 = arith.constant 9.99999974E-6 : f32
    %21 = vector.broadcast %cst_8 : f32 to vector<2x1x1xf32>
    %22 = arith.addf %20, %21 : vector<2x1x1xf32>
    %23 = tpu.reciprocal %22 {approx = true} : vector<2x1x1xf32> -> vector<2x1x1xf32>
    %24 = vector.broadcast %23 : vector<2x1x1xf32> to vector<2x1x256xf32>
    %25 = arith.mulf %14, %24 : vector<2x1x256xf32>
    %c0_9 = arith.constant 0 : index
    %c0_10 = arith.constant 0 : index
    %c0_11 = arith.constant 0 : index
    %26 = vector.load %arg1[%c0_9, %c0_10, %c0_11] : memref<2x1x1xf32, #tpu.memory_space<vmem>>, vector<2x1x1xf32>
    %27 = vector.broadcast %26 : vector<2x1x1xf32> to vector<2x1x256xf32>
    %28 = arith.mulf %25, %27 : vector<2x1x256xf32>
    %c0_12 = arith.constant 0 : index
    %c0_13 = arith.constant 0 : index
    %c0_14 = arith.constant 0 : index
    %29 = vector.load %arg2[%c0_12, %c0_13, %c0_14] : memref<2x1x1xf32, #tpu.memory_space<vmem>>, vector<2x1x1xf32>
    %30 = vector.broadcast %29 : vector<2x1x1xf32> to vector<2x1x256xf32>
    %31 = arith.addf %28, %30 : vector<2x1x256xf32>
    %32 = arith.negf %31 : vector<2x1x256xf32>
    %33 = math.exp %32 : vector<2x1x256xf32>
    %cst_15 = arith.constant 1.000000e+00 : f32
    %34 = vector.broadcast %cst_15 : f32 to vector<2x1x256xf32>
    %35 = arith.addf %34, %33 : vector<2x1x256xf32>
    %36 = arith.divf %34, %35 : vector<2x1x256xf32>
    %37 = vector.broadcast %36 : vector<2x1x256xf32> to vector<2x2x256xf32>
    %38 = arith.mulf %0, %37 : vector<2x2x256xf32>
    %c0_16 = arith.constant 0 : index
    %c0_17 = arith.constant 0 : index
    %c0_18 = arith.constant 0 : index
    %39 = vector.load %arg4[%c0_16, %c0_17, %c0_18] : memref<2x2x256xf32, #tpu.memory_space<vmem>>, vector<2x2x256xf32>
    tpu.vector_store %arg4[%c0_16, %c0_17, %c0_18], %38 {strides = array<i32>} : memref<2x2x256xf32, #tpu.memory_space<vmem>>, vector<2x2x256xf32>,
    return
  }
  func.func @transform_0(%arg0: i32) -> (i32, i32, i32) {
    %c0_i32 = arith.constant 0 : i32
    %c0_i32_0 = arith.constant 0 : i32
    %c0_i32_1 = arith.constant 0 : i32
    return %arg0, %c0_i32, %c0_i32_0 : i32, i32, i32
  }
  func.func @transform_1(%arg0: i32) -> (i32, i32, i32) {
    %c0_i32 = arith.constant 0 : i32
    %c0_i32_0 = arith.constant 0 : i32
    %c0_i32_1 = arith.constant 0 : i32
    return %arg0, %c0_i32, %c0_i32_0 : i32, i32, i32
  }
  func.func @transform_2(%arg0: i32) -> (i32, i32, i32) {
    %c0_i32 = arith.constant 0 : i32
    %c0_i32_0 = arith.constant 0 : i32
    %c0_i32_1 = arith.constant 0 : i32
    return %arg0, %c0_i32, %c0_i32_0 : i32, i32, i32
  }
  func.func @transform_3(%arg0: i32) -> (i32, i32, i32) {
    %c0_i32 = arith.constant 0 : i32
    %c0_i32_0 = arith.constant 0 : i32
    %c0_i32_1 = arith.constant 0 : i32
    return %arg0, %c0_i32, %c0_i32_0 : i32, i32, i32
  }
}

</mosaic_0001>

<bundles_post_ra>
// kernel: tpu_custom_call.1
= control target key start
LH: loop header
LB: loop body
LE: loop exit
PB: predicated region body
PF: predicated region fallthrough
CT: control target
= control target key end

     0   :  { %8 = vsyncpa [#allocation3], 0  ;;  %s888_s0 = inlined_call_operand.vmem [shape: f32[4,1,1], index: 0, kind: input, shape index: {}]   ;;  %s889_s1 = inlined_call_operand.vmem [shape: f32[4,1,1], index: 1, kind: input, shape index: {}]   ;;  %s890_s2 = inlined_call_operand.vmem [shape: f32[4,2,256], index: 2, kind: input, shape index: {}]   ;;  %s891_s3 = inlined_call_operand.hbm [shape: f32[4,2,256], index: 3, kind: output, shape index: {}]  }
   0x1   :  { %10 = vsyncpa [#allocation3 + $0x1], 0  ;;  %s744_s12 = smov 0   ;;  %s746_s13 = smov 0  }
   0x2   :  { %s748_s14 = smov 0   ;;  %s750_s15 = smov 0  }
   0x3 LB: > { %s765_s16 = sadd.s32 4294967295, %s716_s15   ;;  %s561_s17 = sadd.s32 4294967294, %s716_s15   ;;  %s716_s15 = sphi %s750_s15, %s897_s15   ;;  %s712_s14 = sphi %s748_s14, %s896_s14   ;;  %s708_s13 = sphi %s746_s13, %s895_s13   ;;  %s704_s12 = sphi %s744_s12, %s894_s12  }
   0x4   : > { %s769_s18 = sadd.s32 1, %s716_s15   ;;  %s101_s19 = sadd.s32 1, %s712_s14 }
   0x5   : > { %s98_s20 = ssub.s32 %s716_s15, %s769_s18  ;;  %p111_p0 = scmp.ne.s32.totalorder %s712_s14, %s708_s13 }
   0x6   : > { %p99_p1 = scmp.eq.s32.totalorder %s98_s20, 0  ;;  %p112_p2 = scmp.eq.s32.totalorder %s765_s16, 1 }
   0x7   : > { %p117_p3 = scmp.ne.s32.totalorder %s708_s13, %s704_s12  ;;  %p118_p4 = scmp.eq.s32.totalorder %s561_s17, 1 }
   0x8   : > { %s780_s21 = scalar_select %p99_p1, %s712_s14, %s101_s19  }
   0x9   : > { %p782_p5 = por %p112_p2, %p111_p0  ;;  %p786_p6 = por %p118_p4, %p117_p3 }
   0xa   : > { %p564_p7 = scmp.ge.s32.totalorder %s716_s15, 1  ;;  %p162_p8 = scmp.lt.s32.totalorder %s716_s15, 3 }
   0xc   : > { %p163_p9 = pnand %p564_p7, %p162_p8 }
   0xd   : > { %s566_s24 = sshll.u32 (!%p163_p9), %s765_s16, 1  ;;  %v220_v0 = vlaneseq (!%p163_p9)  ;;  %v718_v1 = vmov (!%p163_p9), 1983009808   ;;  %vm237_vm0 = vcmask (!%p163_p9), 1041408   ;;  %v719_v18 = vmov (!%p163_p9), 0   ;;  %s192_s8 = sand.u32 (!%p163_p9), 1, %s708_s13  }
   0xe   : > { %166 = sbr.rel (%p163_p9) target bundleno = 579 (0x243), region = 32  ;;  %p196_p10 = scmp.lt.s32.totalorder (!%p163_p9), %s566_s24, 3  ;;  %v218_v2 = vunpack.c.l.s4 (!%p163_p9), %v718_v1  ;;  %629 = vset.pattern.permute.xlu1 (!%p163_p9), %v719_v18  ;;  %628 = vset.pattern.permute.xlu0 (!%p163_p9), %v719_v18  ;;  %v720_v19 = vmov (!%p163_p9), 269488144  }
   0xf   : > { %v793_v3 = vshrl.u32 (!%p163_p9), %v220_v0, 7  ;;  %v254_v20 = vunpack.c.l.s4 (!%p163_p9), %v720_v19  ;;  %s565_s9 = sshll.u32 (!%p163_p9), %s192_s8, 3  ;;  %s583_s10 = sshll.u32 (!%p163_p9), %s765_s16, 7 }
  0x10   : > { %v219_v4 = vunpack.c.0.s8 (!%p163_p9), %v218_v2  ;;  %s194_s11 = scalar_lea.vmem (!%p163_p9), [#allocation2], %s565_s9  ;;  %s721_s26 = smov (!%p163_p9), [#allocation2]  }
  0x11   : > { %v255_v21 = vunpack.c.0.s8 (!%p163_p9), %v254_v20  ;;  %s481_s17 = sshll.u32 (!%p163_p9), %s194_s11, 4  ;;  %s658_s27 = sshll.u32 (!%p163_p9), %s721_s26, 4  ;;  %s844_s17 = int_to_ptr.vmem [resolvable:$true] %s481_s17  ;;  %s659_s27 = int_to_ptr.vmem [resolvable:$false] %s658_s27 }
  0x12   : > { %v799_v5 = vsub.s32 (!%p163_p9), %v219_v4, %v793_v3  ;;  %s654_s16 = scalar_lea.vmem (!%p163_p9), %s844_s17, 128  ;;  %p661_p0 = scmp.lt.s32.totalorder (!%p163_p9), %s844_s17, %s659_s27 }
  0x13   : > { %v258_v22 = vsub.s32 (!%p163_p9), %v255_v21, %v793_v3  ;;  %p655_p11 = scmp.ne.s32.totalorder (!%p163_p9), %s844_s17, %s654_s16 }
  0x15   : > { %s899_s24 = smov (!%p196_p10, %s566_s24), 3  ;;  %p656_p12 = pnand %p655_p11, %p782_p5 }
  0x16   : > { %s581_s25 = sshll.u32 %s899_s24, 2  ;;  %s198_s4 = scalar_lea.vmem %s888_s0, %s899_s24 }
  0x17   : > { %s210_s28 = scalar_lea.vmem %s890_s2, %s581_s25  ;;  %v369_v1 = vld [vmem:[%s198_s4 + $0x1] sm:$0x1]  ;;  %s203_s7 = scalar_lea.vmem %s889_s1, %s899_s24  ;;  %v368_v21 = vld [vmem:[%s198_s4] sm:$0x1] }
  0x18   : > { %v804_v6 = vld [vmem:[%s210_s28] sm:$0xf]  ;;  %v806_v7 = vld [vmem:[%s210_s28 + $0x4] sm:$0xf]  ;;  %s842_s24 = scalar_lea.hbm %s891_s3, %s583_s10  ;;  %s847_s25 = scalar_lea.sflag [#allocation3], %s192_s8 }
  0x19   : > { %v223_v8 = vrot.slane %v804_v6, %v799_v5  ;;  %v231_v9 = vrot.slane %v806_v7, %v799_v5  ;;  %v392_v20 = vld [vmem:[%s203_s7] sm:$0x1]  ;;  %p657_p13 = pneg %p656_p12  ;;  %s660_s28 = scalar_lea.vmem %s659_s27, 256 }
  0x1a   : > { %p662_p1 = scmp.lt.s32.totalorder %s660_s28, %s654_s16 }
  0x1b   : > { %v224_v10 = vcombine.high %v223_v8, %v223_v8  ;;  %v238_v11 = vsel %vm237_vm0, %v223_v8, 0.0  ;;  %v232_v12 = vcombine.high %v231_v9, %v231_v9  ;;  %v243_v14 = vsel %vm237_vm0, %v231_v9, 0.0 }
  0x1c   : > { %p663_p2 = por %p662_p1, %p661_p0 }
  0x1d   : > { %v239_v13 = vsel %vm237_vm0, %v224_v10, 0.0  ;;  %v244_v15 = vsel %vm237_vm0, %v232_v12, 0.0 }
  0x1e   : > { %v240_v16 = vadd.f32 %v239_v13, %v238_v11  ;;  %v245_v17 = vadd.f32 %v244_v15, %v243_v14  ;;  %p664_p3 = pnand %p663_p2, %p657_p13 }
  0x20   : > { %241 = vadd.xlane.f32.xlu0 %v240_v16 }
  0x24   : > { %246 = vadd.xlane.f32.xlu0 %v245_v17 }
  0xad   : > { %v242_v23 = vpop.xlane.xlu0 %241 }
  0xae   : > { %v249_v24 = vmul.f32 0.00390625, %v242_v23 }
  0xb0   : > { %v259_v25 = vrot.slane %v249_v24, %v258_v22 }
  0xb1   : > { %v247_v26 = vpop.xlane.xlu0 %246 }
  0xb2   : > { %v269_v27 = vmul.f32 %v259_v25, %v804_v6  ;;  %v250_v28 = vmul.f32 0.00390625, %v247_v26 }
  0xb4   : > { %v279_v29 = vrot.slane %v269_v27, %v799_v5  ;;  %v266_v30 = vrot.slane %v250_v28, %v258_v22  ;;  %v393_v22 = vld [vmem:[%s203_s7 + $0x1] sm:$0x1] }
  0xb6   : > { %v280_v31 = vcombine.high %v279_v29, %v279_v29  ;;  %v270_v32 = vmul.f32 %v266_v30, %v806_v7  ;;  %v293_v33 = vsel %vm237_vm0, %v279_v29, 0.0 }
  0xb7   : > { %v294_v34 = vrot.slane %v293_v33, 4 }
  0xb8   : > { %v287_v35 = vrot.slane %v270_v32, %v799_v5  ;;  %v300_v36 = vsel %vm237_vm0, %v280_v31, 0.0 }
  0xb9   : > { %v295_v37 = vadd.f32 %v294_v34, %v293_v33  ;;  %v301_v38 = vrot.slane %v300_v36, 4 }
  0xba   : > { %v288_v39 = vcombine.high %v287_v35, %v287_v35  ;;  %v307_v40 = vsel %vm237_vm0, %v287_v35, 0.0 }
  0xbb   : > { %v296_v41 = vrot.slane %v295_v37, 2  ;;  %v302_v42 = vadd.f32 %v301_v38, %v300_v36  ;;  %v308_v43 = vrot.slane %v307_v40, 4 }
  0xbc   : > { %v314_v44 = vsel %vm237_vm0, %v288_v39, 0.0 }
  0xbd   : > { %v297_v45 = vadd.f32 %v296_v41, %v295_v37  ;;  %v303_v46 = vrot.slane %v302_v42, 2  ;;  %v309_v47 = vadd.f32 %v308_v43, %v307_v40  ;;  %v315_v48 = vrot.slane %v314_v44, 4 }
  0xbe   : > { %v377_v41 = vsub.s32 0, %v793_v3 }
  0xbf   : > { %v298_v49 = vrot.slane %v297_v45, 1  ;;  %v304_v50 = vadd.f32 %v303_v46, %v302_v42  ;;  %v310_v51 = vrot.slane %v309_v47, 2  ;;  %v316_v52 = vadd.f32 %v315_v48, %v314_v44 }
  0xc1   : > { %v305_v53 = vrot.slane %v304_v50, 1  ;;  %v311_v54 = vadd.f32 %v310_v51, %v309_v47  ;;  %v317_v55 = vrot.slane %v316_v52, 2  ;;  %v299_v56 = vadd.f32 %v298_v49, %v297_v45 }
  0xc3   : > { %v306_v57 = vadd.f32 %v305_v53, %v304_v50  ;;  %v312_v58 = vrot.slane %v311_v54, 1  ;;  %v318_v59 = vadd.f32 %v317_v55, %v316_v52 }
  0xc5   : > { %v321_v60 = vadd.f32 %v306_v57, %v299_v56  ;;  %v319_v61 = vrot.slane %v318_v59, 1  ;;  %v313_v62 = vadd.f32 %v312_v58, %v311_v54 }
  0xc7   : > { %322 = vadd.xlane.f32.xlu1 %v321_v60  ;;  %v320_v63 = vadd.f32 %v319_v61, %v318_v59 }
  0xc9   : > { %v324_v0 = vadd.f32 %v320_v63, %v313_v62 }
  0xcb   : > { %325 = vadd.xlane.f32.xlu1 %v324_v0 }
  0xdc   : > { %381 = vperm.xlu1 %629, %v369_v1  }
 0x154   : > { %v323_v2 = vpop.xlane.xlu1 %322 }
 0x155   : > { %v327_v4 = vmul.f32 0.00390625, %v323_v2 }
 0x157   : > { %v329_v8 = vsub.f32 %v299_v56, %v327_v4  ;;  %v330_v9 = vsub.f32 %v306_v57, %v327_v4 }
 0x158   : > { %v326_v10 = vpop.xlane.xlu1 %325 }
 0x159   : > { %v328_v11 = vmul.f32 0.00390625, %v326_v10  ;;  %v333_v12 = vmul.f32 %v329_v8, %v329_v8  ;;  %v334_v13 = vmul.f32 %v330_v9, %v330_v9 }
 0x15b   : > { %v331_v14 = vsub.f32 %v313_v62, %v328_v11  ;;  %v332_v15 = vsub.f32 %v320_v63, %v328_v11  ;;  %v337_v16 = vadd.f32 %v334_v13, %v333_v12 }
 0x15c   : > { %v382_v23 = vpop.permute.xlu1 %381 }
 0x15d   : > { %338 = vadd.xlane.f32.xlu0 %v337_v16  ;;  %v335_v17 = vmul.f32 %v331_v14, %v331_v14  ;;  %v336_v18 = vmul.f32 %v332_v15, %v332_v15  ;;  %v387_v52 = vrot.slane %v382_v23, %v377_v41 }
 0x15f   : > { %v340_v19 = vadd.f32 %v336_v18, %v335_v17 }
 0x161   : > { %341 = vadd.xlane.f32.xlu1 %v340_v19 }
 0x172   : > { %396 = vperm.xlu1 %629, %v392_v20  }
 0x173   : > { %372 = vperm.xlu0 %628, %v368_v21  }
 0x176   : > { %405 = vperm.xlu1 %629, %v393_v22  }
 0x1ea   : > { %v339_v24 = vpop.xlane.xlu0 %338 }
 0x1eb   : > { %v344_v25 = vmul.f32 0.003921569, %v339_v24 }
 0x1ed   : > { %630 = vrsqrt.f32 %v344_v25  ;;  %vm348_vm1 = vcmp.eq.f32.partialorder %v344_v25, inf  ;;  %v351_v30 = vand.u32 2147483648, %v344_v25  ;;  %vm350_vm2 = vcmp.eq.f32.partialorder %v344_v25, 0.0 }
 0x1ee   : > { %v342_v26 = vpop.xlane.xlu1 %341 }
 0x1ef   : > { %v345_v27 = vmul.f32 0.003921569, %v342_v26 }
 0x1f1   : > { %632 = vrsqrt.f32 %v345_v27  ;;  %vm355_vm3 = vcmp.eq.f32.partialorder %v345_v27, inf  ;;  %v358_v36 = vand.u32 2147483648, %v345_v27  ;;  %vm357_vm4 = vcmp.eq.f32.partialorder %v345_v27, 0.0 }
 0x1f2   : > { %v373_v40 = vpop.permute.xlu0 %372  ;;  %v397_v42 = vpop.permute.xlu1 %396 }
 0x1f3   : > { %v378_v43 = vrot.slane %v373_v40, %v377_v41  ;;  %v402_v47 = vrot.slane %v397_v42, %v377_v41 }
 0x1f6   : > { %v406_v48 = vpop.permute.xlu1 %405 }
 0x1f7   : > { %v631_v28 = vpop.eup %630  ;;  %v411_v57 = vrot.slane %v406_v48, %v377_v41 }
 0x1f8   : > { %v347_v29 = vmul.f32 %v631_v28, %v344_v25 }
 0x1fa   : > { %v349_v31 = vsel %vm348_vm1, %v344_v25, %v347_v29 }
 0x1fb   : > { %v633_v32 = vpop.eup %632  ;;  %v352_v33 = vsel %vm350_vm2, %v351_v30, %v349_v31 }
 0x1fc   : > { %v354_v34 = vmul.f32 %v633_v32, %v345_v27  ;;  %v360_v35 = vadd.f32 1e-05, %v352_v33 }
 0x1fe   : > { %v356_v37 = vsel %vm355_vm3, %v345_v27, %v354_v34  ;;  %634 = vrcp.f32 %v360_v35 }
 0x1ff   : > { %v359_v38 = vsel %vm357_vm4, %v358_v36, %v356_v37 }
 0x200   : > { %v361_v39 = vadd.f32 1e-05, %v359_v38 }
 0x202   : > { %636 = vrcp.f32 %v361_v39 }
 0x208   : > { %v635_v44 = vpop.eup %634 }
 0x209   : > { %v364_v45 = vmul.f32 %v635_v44, %v329_v8  ;;  %v365_v46 = vmul.f32 %v635_v44, %v330_v9 }
 0x20b   : > { %v388_v49 = vmul.f32 %v378_v43, %v364_v45  ;;  %v389_v50 = vmul.f32 %v378_v43, %v365_v46 }
 0x20c   : > { %v637_v51 = vpop.eup %636 }
 0x20d   : > { %v366_v53 = vmul.f32 %v637_v51, %v331_v14  ;;  %v367_v54 = vmul.f32 %v637_v51, %v332_v15  ;;  %v412_v55 = vadd.f32 %v402_v47, %v388_v49  ;;  %v413_v56 = vadd.f32 %v402_v47, %v389_v50 }
 0x20f   : > { %v390_v58 = vmul.f32 %v387_v52, %v366_v53  ;;  %v391_v59 = vmul.f32 %v387_v52, %v367_v54  ;;  %v571_v60 = vmul.f32 -1.442695, %v412_v55  ;;  %v572_v3 = vmul.f32 -1.442695, %v413_v56 }
 0x211   : > { %v414_v61 = vadd.f32 %v411_v57, %v390_v58  ;;  %v415_v62 = vadd.f32 %v411_v57, %v391_v59  ;;  %638 = vpow2.f32 %v571_v60 }
 0x212   : > { %640 = vpow2.f32 %v572_v3 }
 0x213   : > { %v573_v63 = vmul.f32 -1.442695, %v414_v61  ;;  %v574_v0 = vmul.f32 -1.442695, %v415_v62 }
 0x215   : > { %642 = vpow2.f32 %v573_v63 }
 0x216   : > { %644 = vpow2.f32 %v574_v0 }
 0x21b   : > { %v639_v1 = vpop.eup %638 }
 0x21c   : > { %v641_v2 = vpop.eup %640  ;;  %v428_v4 = vadd.f32 1.0, %v639_v1 }
 0x21d   : > { %v429_v8 = vadd.f32 1.0, %v641_v2 }
 0x21e   : > { %646 = vrcp.f32 %v428_v4 }
 0x21f   : > { %v643_v9 = vpop.eup %642  ;;  %648 = vrcp.f32 %v429_v8 }
 0x220   : > { %v645_v10 = vpop.eup %644  ;;  %v430_v11 = vadd.f32 1.0, %v643_v9 }
 0x221   : > { %v431_v12 = vadd.f32 1.0, %v645_v10 }
 0x222   : > { %650 = vrcp.f32 %v430_v11 }
 0x223   : > { %652 = vrcp.f32 %v431_v12 }
 0x228   : > { %v647_v13 = vpop.eup %646 }
 0x229   : > { %v649_v14 = vpop.eup %648 }
 0x22a   : > { %v444_v15 = vcombine.low %v647_v13, %v649_v14 }
 0x22c   : > { %v651_v16 = vpop.eup %650  ;;  %v451_v17 = vrot.slane %v444_v15, %v799_v5 }
 0x22d   : > { %v653_v18 = vpop.eup %652 }
 0x22e   : > { %v452_v19 = vcombine.low %v651_v16, %v653_v18  ;;  %v462_v20 = vmul.f32 %v451_v17, %v804_v6 }
 0x230   : > { %v459_v21 = vrot.slane %v452_v19, %v799_v5  ;;  %464 = vst [vmem:[%s194_s11] sm:$0xf] %v462_v20 }
 0x232   : > { %v463_v22 = vmul.f32 %v459_v21, %v806_v7 }
 0x234   : > { %465 = vst [vmem:[%s194_s11 + $0x4] sm:$0xf] %v463_v22 }
 0x235   : > { %667 = shalt.err (!%p664_p3)
}
 0x236   : > { %s668_s29 = scalar_lea.hbm %s842_s24, 128  ;;  %s672_s5 = scalar_lea.hbm %s891_s3, 256 }
 0x237   : > { %p669_p4 = scmp.ne.s32.totalorder %s842_s24, %s668_s29  ;;  %p673_p9 = scmp.lt.u32.totalorder %s842_s24, %s891_s3 }
 0x238   : > { %p674_p10 = scmp.lt.u32.totalorder %s672_s5, %s668_s29  ;;  %p676_p12 = scmp.lt.u32.totalorder %s668_s29, %s842_s24 }
 0x239   : > { %p670_p7 = pnand %p669_p4, %p782_p5 }
 0x23a   : > { %p675_p11 = por %p674_p10, %p673_p9 }
 0x23b   : > { %p671_p8 = pneg %p670_p7 }
 0x23c   : > { %p677_p13 = por %p676_p12, %p675_p11 }
 0x23e   : > { %p678_p0 = pnand %p677_p13, %p671_p8 }
 0x240   : > { %681 = shalt.err (!%p678_p0)
}
 0x241   : > { %s722_s8 = smov 64   ;;  %s723_s9 = smov 4  }
 0x242   : > { %584 = dma.vmem_to_hbm [thread:$0]  (%p782_p5), %s844_s17, 128, %s842_s24, %s847_s25, %s722_s8, %s722_s8, %s723_s9  }
 0x243 PF: > { %p590_p1 = scmp.ge.s32.totalorder %s716_s15, 2  ;;  %s496_s10 = sand.u32 1, %s704_s12  }
 0x244   : > { %s497_s11 = scalar_lea.sflag [#allocation3], %s496_s10 }
 0x245   : > { %p587_p2 = pnand %p590_p1, %p786_p6 }
 0x247   : > { %699 = dma.done.wait (!%p587_p2), %s497_s11, 128  }
 0x248   : > { %701 = vsyncadd (!%p587_p2), %s497_s11, 4294967168  ;;  %p13_p3 = scmp.ge.s32.totalorder %s769_s18, 4   ;;  %s894_s12 = smov %s708_s13 }
 0x249   : > { %s895_s13 = smov %s712_s14  ;;  %s896_s14 = smov %s780_s21 }
 0x24a   : > { %s897_s15 = smov %s769_s18  ;;  %15 = sbr.rel (!%p13_p3) target bundleno = 3 (0x3), region = 73 }
 0x251   :  { %502 = vsyncpa [#allocation3], 1 }
 0x252   :  { %504 = vsyncpa [#allocation3 + $0x1], 1 }

</bundles_post_ra>
